<compile_context>
chip_gen: v5e
topology: v5e:2x2
jax: 0.10.0
libtpu: 0.0.40
codegen_flags: <defaults>
</compile_context>

<pallas_src>
import functools

import jax
import jax.numpy as jnp
from jax.experimental import pallas as pl
from jax.experimental.pallas import tpu as pltpu

LN_EPS = 1e-5

_TARGET_BLOCK_BYTES = 4 << 20          # ~4 MiB input blocks (x2 pipeline buffers)
_VMEM_LIMIT_BYTES = 48 * 1024 * 1024   # > v5e's 16 MiB scoped default, < v7x 64 MiB physical


def _merge_kernel(x_ref, w_ref, b_ref, gamma_ref, beta_ref, o_ref, *, inv_ms):
    """One (batch, window-tile) block.

    x_ref:     [TILE_G, ms*C]  TILE_G merge windows, window folded into lanes
    w_ref:     [ms*C, OC]      fc weight transposed and tiled ms times along K
    b_ref:     [1, OC]         fc bias
    gamma_ref: [1, OC]         LayerNorm weight
    beta_ref:  [1, OC]         LayerNorm bias
    o_ref:     [TILE_G, OC]    output block
    """
    # Window-sum + Linear in a single MXU matmul (K = ms*C); accumulate in f32.
    y = jnp.dot(x_ref[...], w_ref[...], preferred_element_type=jnp.float32)
    # Exact window mean: scale the f32 accumulator by 1/ms (one VPU mul, free
    # under the HBM-bound roofline), then add the bias.
    y = y * inv_ms + b_ref[...].astype(jnp.float32)               # [TILE_G, OC]

    # LayerNorm over channels (biased variance, eps = 1e-5), stats in f32.
    mu = jnp.mean(y, axis=-1, keepdims=True)
    d = y - mu
    var = jnp.mean(d * d, axis=-1, keepdims=True)
    out = d * jax.lax.rsqrt(var + LN_EPS)
    out = (out * gamma_ref[...].astype(jnp.float32)
           + beta_ref[...].astype(jnp.float32))
    o_ref[...] = out.astype(o_ref.dtype)


def _pick_tile_g(G, window_bytes, prefer_multi_step):
    """Merge windows per block: multiple of 8 (or the full G), ~4 MiB of input."""
    if G <= 8:
        return G                                   # one full-dim block (layout-legal)
    tg = _TARGET_BLOCK_BYTES // max(1, window_bytes)
    tg = max(8, (min(G, tg) // 8) * 8)
    if prefer_multi_step and -(-G // tg) < 2:      # keep both v7x TensorCores busy
        tg = max(8, ((G // 2) // 8) * 8)
    return tg


@functools.partial(jax.jit, static_argnames=("num_wtok", "merge_scale"))
def speech_dw_merge_block(x, fc_w, fc_b, ln_w, ln_b, *, num_wtok, merge_scale):
    """x: [B, num_wtok + T, C]  ->  [B, ceil(T / ms), 2*C]"""
    B, N, C = x.shape
    T = N - num_wtok
    OC = fc_w.shape[0]
    ms = T if merge_scale == -1 else merge_scale
    G = -(-T // ms)                                # ceil(T / ms) merge windows
    pad = G * ms - T

    # Drop the word tokens, zero-pad the ragged tail, and fold each merge window
    # into the lane dimension ([B, G, ms*C]).  XLA fuses slice+pad+reshape into a
    # single copy of the feature tokens.
    # TODO(synk): that copy could be removed entirely by passing the full x with
    # memory_space=pl.ANY and issuing the num_wtok-offset block DMAs manually
    # (or via element-offset indexing on the token dim).
    x_fea = x[:, num_wtok:, :]
    if pad:
        x_fea = jnp.pad(x_fea, ((0, 0), (0, pad), (0, 0)))
    x_win = x_fea.reshape(B, G, ms * C)

    # fc weight: transpose once and tile ms times along K so that
    #   x_win_block @ w_tiled == (window sum) @ W^T      (exact; no 1/ms here).
    # TODO(synk): for merge_scale == -1 (global pooling) the tiled weight grows
    # with T; a reduction-grid variant would be preferable for that config.
    w_tiled = jnp.tile(jnp.transpose(fc_w), (ms, 1))               # [ms*C, OC]

    itemsize = jnp.dtype(x.dtype).itemsize
    tile_g = _pick_tile_g(G, ms * C * itemsize, prefer_multi_step=(B == 1))
    gt_steps = -(-G // tile_g)

    cost = pl.CostEstimate(
        flops=2 * B * G * ms * C * OC,
        transcendentals=B * G,                     # one rsqrt per output row
        bytes_accessed=(B * G * ms * C * itemsize              # x read
                        + B * G * OC * itemsize                # out write
                        + ms * C * OC * jnp.dtype(fc_w.dtype).itemsize))

    # TODO(synk): pipeline_mode=pl.Buffered(1) on the four constant-index param
    # specs would drop their redundant second VMEM buffer (headroom only).
    out = pl.pallas_call(
        functools.partial(_merge_kernel, inv_ms=1.0 / ms),
        out_shape=jax.ShapeDtypeStruct((B, G, OC), x.dtype),
        grid=(B, gt_steps),
        in_specs=[
            pl.BlockSpec((None, tile_g, ms * C), lambda b, g: (b, g, 0)),
            pl.BlockSpec((ms * C, OC), lambda b, g: (0, 0)),   # resident weight
            pl.BlockSpec((1, OC), lambda b, g: (0, 0)),        # resident bias
            pl.BlockSpec((1, OC), lambda b, g: (0, 0)),        # resident gamma
            pl.BlockSpec((1, OC), lambda b, g: (0, 0)),        # resident beta
        ],
        out_specs=pl.BlockSpec((None, tile_g, OC), lambda b, g: (b, g, 0)),
        compiler_params=pltpu.CompilerParams(
            dimension_semantics=("parallel", "parallel"),
            vmem_limit_bytes=_VMEM_LIMIT_BYTES),
        cost_estimate=cost,
    )(x_win, w_tiled,
      fc_b.reshape(1, OC), ln_w.reshape(1, OC), ln_b.reshape(1, OC))

    return out


def _reference(x, fc_w, fc_b, ln_w, ln_b, num_wtok, merge_scale):
    """Pure-JAX reference mirroring the PyTorch forward."""
    B, N, C = x.shape
    T = N - num_wtok
    x_fea = x[:, num_wtok:, :]
    ms = T if merge_scale == -1 else merge_scale
    need_pad = T % ms
    if need_pad:
        x_fea = jnp.pad(x_fea, ((0, 0), (0, ms - need_pad), (0, 0)))
        T += ms - need_pad
    pooled = x_fea.reshape(B, T // ms, ms, C).mean(axis=2)
    y = pooled @ fc_w.T + fc_b
    mu = y.mean(-1, keepdims=True)
    var = ((y - mu) ** 2).mean(-1, keepdims=True)
    return (y - mu) / jnp.sqrt(var + LN_EPS) * ln_w + ln_b


if __name__ == "__main__":
    # Small shapes consistent with the module.
    B = 2
    C = 32             # in_channels
    expand = 2
    OC = C * expand    # out_channels = 64
    num_wtok = 2
    T = 14             # feature tokens (ragged: exercises the zero-padded tail)
    merge_scale = 4

    key = jax.random.PRNGKey(0)
    k_x, k_w, k_b, k_g, k_beta = jax.random.split(key, 5)

    x = jax.random.normal(k_x, (B, num_wtok + T, C), dtype=jnp.float32)
    fc_w = jax.random.normal(k_w, (OC, C), dtype=jnp.float32) * 0.1   # [out, in]
    fc_b = jax.random.normal(k_b, (OC,), dtype=jnp.float32) * 0.1
    ln_w = 1.0 + 0.05 * jax.random.normal(k_g, (OC,), dtype=jnp.float32)
    ln_b = 0.05 * jax.random.normal(k_beta, (OC,), dtype=jnp.float32)

    out = speech_dw_merge_block(
        x, fc_w, fc_b, ln_w, ln_b, num_wtok=num_wtok, merge_scale=merge_scale)
    out = jax.block_until_ready(out)

    ref = _reference(x, fc_w, fc_b, ln_w, ln_b, num_wtok, merge_scale)
    G = (T + merge_scale - 1) // merge_scale
    assert out.shape == (B, G, OC), out.shape
    # Tolerance covers default-precision f32 MXU matmuls on TPU (kernel vs. XLA
    # reference); any structural bug (wrong windowing / norm) produces O(1) errors.
    assert jnp.allclose(out, ref, atol=5e-3, rtol=5e-3), float(
        jnp.max(jnp.abs(out - ref)))

    print("KERNEL_OK")
</pallas_src>

<mosaic_0001>
module attributes {stable_mosaic.version = 11 : i64} {
  func.func @_merge_kernel(%arg0: i32, %arg1: i32, %arg2: memref<1x4x128xf32, #tpu.memory_space<vmem>>, %arg3: memref<128x64xf32, #tpu.memory_space<vmem>>, %arg4: memref<1x64xf32, #tpu.memory_space<vmem>>, %arg5: memref<1x64xf32, #tpu.memory_space<vmem>>, %arg6: memref<1x64xf32, #tpu.memory_space<vmem>>, %arg7: memref<1x4x64xf32, #tpu.memory_space<vmem>>) attributes {dimension_semantics = [#tpu.dimension_semantics<parallel>, #tpu.dimension_semantics<parallel>], iteration_bounds = array<i64: 2, 1>, scalar_prefetch = 0 : i64, scratch_operands = 0 : i64, tpu.core_type = #tpu.core_type<tc>, window_params = [{transform_indices = @transform_0, window_bounds = array<i64: 1, 4, 128>}, {pipeline_mode = #tpu.pipeline_mode<synchronous>, transform_indices = @transform_1, window_bounds = array<i64: 128, 64>}, {pipeline_mode = #tpu.pipeline_mode<synchronous>, transform_indices = @transform_2, window_bounds = array<i64: 1, 64>}, {pipeline_mode = #tpu.pipeline_mode<synchronous>, transform_indices = @transform_3, window_bounds = array<i64: 1, 64>}, {pipeline_mode = #tpu.pipeline_mode<synchronous>, transform_indices = @transform_4, window_bounds = array<i64: 1, 64>}, {transform_indices = @transform_5, window_bounds = array<i64: 1, 4, 64>}]} {
    %c0 = arith.constant 0 : index
    %c0_0 = arith.constant 0 : index
    %c0_1 = arith.constant 0 : index
    %0 = vector.load %arg2[%c0, %c0_0, %c0_1] : memref<1x4x128xf32, #tpu.memory_space<vmem>>, vector<1x4x128xf32>
    %1 = vector.shape_cast %0 : vector<1x4x128xf32> to vector<4x128xf32>
    %c0_2 = arith.constant 0 : index
    %c0_3 = arith.constant 0 : index
    %2 = vector.load %arg3[%c0_2, %c0_3] : memref<128x64xf32, #tpu.memory_space<vmem>>, vector<128x64xf32>
    %cst = arith.constant dense<0.000000e+00> : vector<4x64xf32>
    %3 = tpu.matmul %1, %2, %cst {dimension_numbers = #tpu.dot_dimension_numbers<[1], [0], [0], [1], [0, 0, 1, 1], [], []>} : vector<4x128xf32>, vector<128x64xf32>, vector<4x64xf32> -> vector<4x64xf32>
    %cst_4 = arith.constant 2.500000e-01 : f32
    %4 = vector.broadcast %cst_4 : f32 to vector<4x64xf32>
    %5 = arith.mulf %3, %4 : vector<4x64xf32>
    %c0_5 = arith.constant 0 : index
    %c0_6 = arith.constant 0 : index
    %6 = vector.load %arg4[%c0_5, %c0_6] : memref<1x64xf32, #tpu.memory_space<vmem>>, vector<1x64xf32>
    %7 = vector.broadcast %6 : vector<1x64xf32> to vector<4x64xf32>
    %8 = arith.addf %5, %7 : vector<4x64xf32>
    %cst_7 = arith.constant dense<0.000000e+00> : vector<4xf32>
    %9 = vector.multi_reduction <add>, %8, %cst_7 [1] : vector<4x64xf32> to vector<4xf32>
    %10 = vector.shape_cast %9 : vector<4xf32> to vector<4x1xf32>
    %cst_8 = arith.constant 6.400000e+01 : f32
    %11 = vector.broadcast %cst_8 : f32 to vector<4x1xf32>
    %12 = arith.divf %10, %11 : vector<4x1xf32>
    %13 = vector.broadcast %12 : vector<4x1xf32> to vector<4x64xf32>
    %14 = arith.subf %8, %13 : vector<4x64xf32>
    %15 = arith.mulf %14, %14 : vector<4x64xf32>
    %cst_9 = arith.constant dense<0.000000e+00> : vector<4xf32>
    %16 = vector.multi_reduction <add>, %15, %cst_9 [1] : vector<4x64xf32> to vector<4xf32>
    %17 = vector.shape_cast %16 : vector<4xf32> to vector<4x1xf32>
    %cst_10 = arith.constant 6.400000e+01 : f32
    %18 = vector.broadcast %cst_10 : f32 to vector<4x1xf32>
    %19 = arith.divf %17, %18 : vector<4x1xf32>
    %cst_11 = arith.constant 9.99999974E-6 : f32
    %20 = vector.broadcast %cst_11 : f32 to vector<4x1xf32>
    %21 = arith.addf %19, %20 : vector<4x1xf32>
    %22 = math.rsqrt %21 : vector<4x1xf32>
    %23 = vector.broadcast %22 : vector<4x1xf32> to vector<4x64xf32>
    %24 = arith.mulf %14, %23 : vector<4x64xf32>
    %c0_12 = arith.constant 0 : index
    %c0_13 = arith.constant 0 : index
    %25 = vector.load %arg5[%c0_12, %c0_13] : memref<1x64xf32, #tpu.memory_space<vmem>>, vector<1x64xf32>
    %26 = vector.broadcast %25 : vector<1x64xf32> to vector<4x64xf32>
    %27 = arith.mulf %24, %26 : vector<4x64xf32>
    %c0_14 = arith.constant 0 : index
    %c0_15 = arith.constant 0 : index
    %28 = vector.load %arg6[%c0_14, %c0_15] : memref<1x64xf32, #tpu.memory_space<vmem>>, vector<1x64xf32>
    %29 = vector.broadcast %28 : vector<1x64xf32> to vector<4x64xf32>
    %30 = arith.addf %27, %29 : vector<4x64xf32>
    %c0_16 = arith.constant 0 : index
    %c0_17 = arith.constant 0 : index
    %c0_18 = arith.constant 0 : index
    %31 = vector.load %arg7[%c0_16, %c0_17, %c0_18] : memref<1x4x64xf32, #tpu.memory_space<vmem>>, vector<1x4x64xf32>
    %32 = vector.shape_cast %31 : vector<1x4x64xf32> to vector<4x64xf32>
    %33 = vector.shape_cast %30 : vector<4x64xf32> to vector<1x4x64xf32>
    tpu.vector_store %arg7[%c0_16, %c0_17, %c0_18], %33 {strides = array<i32>} : memref<1x4x64xf32, #tpu.memory_space<vmem>>, vector<1x4x64xf32>,
    return
  }
  func.func @transform_0(%arg0: i32, %arg1: i32) -> (i32, i32, i32) {
    %c0_i32 = arith.constant 0 : i32
    %c0_i32_0 = arith.constant 0 : i32
    return %arg0, %arg1, %c0_i32 : i32, i32, i32
  }
  func.func @transform_1(%arg0: i32, %arg1: i32) -> (i32, i32) {
    %c0_i32 = arith.constant 0 : i32
    %c0_i32_0 = arith.constant 0 : i32
    %c0_i32_1 = arith.constant 0 : i32
    return %c0_i32, %c0_i32_0 : i32, i32
  }
  func.func @transform_2(%arg0: i32, %arg1: i32) -> (i32, i32) {
    %c0_i32 = arith.constant 0 : i32
    %c0_i32_0 = arith.constant 0 : i32
    %c0_i32_1 = arith.constant 0 : i32
    return %c0_i32, %c0_i32_0 : i32, i32
  }
  func.func @transform_3(%arg0: i32, %arg1: i32) -> (i32, i32) {
    %c0_i32 = arith.constant 0 : i32
    %c0_i32_0 = arith.constant 0 : i32
    %c0_i32_1 = arith.constant 0 : i32
    return %c0_i32, %c0_i32_0 : i32, i32
  }
  func.func @transform_4(%arg0: i32, %arg1: i32) -> (i32, i32) {
    %c0_i32 = arith.constant 0 : i32
    %c0_i32_0 = arith.constant 0 : i32
    %c0_i32_1 = arith.constant 0 : i32
    return %c0_i32, %c0_i32_0 : i32, i32
  }
  func.func @transform_5(%arg0: i32, %arg1: i32) -> (i32, i32, i32) {
    %c0_i32 = arith.constant 0 : i32
    %c0_i32_0 = arith.constant 0 : i32
    return %arg0, %arg1, %c0_i32 : i32, i32, i32
  }
}

</mosaic_0001>

<bundles_post_ra>
// kernel: speech_dw_merge_block.1
= control target key start
LH: loop header
LB: loop body
LE: loop exit
PB: predicated region body
PF: predicated region fallthrough
CT: control target
= control target key end

     0   :  { %10 = vsyncpa [#allocation3], 0  ;;  %s759_s0 = inlined_call_operand.vmem [shape: f32[2,4,128], index: 0, kind: input, shape index: {}]   ;;  %s760_s1 = inlined_call_operand.vmem [shape: f32[128,64], index: 1, kind: input, shape index: {}]   ;;  %s761_s2 = inlined_call_operand.vmem [shape: f32[1,64], index: 2, kind: input, shape index: {}]   ;;  %s762_s3 = inlined_call_operand.vmem [shape: f32[1,64], index: 3, kind: input, shape index: {}]   ;;  %s763_s4 = inlined_call_operand.vmem [shape: f32[1,64], index: 4, kind: input, shape index: {}]   ;;  %s764_s5 = inlined_call_operand.hbm [shape: f32[2,4,64], index: 5, kind: output, shape index: {}]  }
   0x1   :  { %12 = vsyncpa [#allocation3 + $0x1], 0  ;;  %s602_s18 = smov 0   ;;  %s604_s19 = smov 0  }
   0x2   :  { %s606_s20 = smov 0   ;;  %s608_s21 = smov 0  }
   0x3   :  { %s610_s22 = smov 0   ;;  %s612_s23 = smov 0  }
   0x4 LB: > { %s417_s24 = sadd.s32 4294967295, %s569_s23   ;;  %s418_s25 = sadd.s32 4294967294, %s569_s23   ;;  %s569_s23 = sphi %s612_s23, %s18_s23   ;;  %s565_s22 = sphi %s610_s22, %s771_s22   ;;  %s561_s21 = sphi %s608_s21, %s770_s21   ;;  %s557_s20 = sphi %s606_s20, %s769_s20   ;;  %s553_s19 = sphi %s604_s19, %s768_s19   ;;  %s549_s18 = sphi %s602_s18, %s767_s18  }
   0x5   : > { %s30_s26 = sadd.s32 1, %s565_s22  ;;  %s151_s27 = sadd.s32 1, %s557_s20 }
   0x6   : > { %p32_p0 = scmp.ge.s32.totalorder %s30_s26, 2  ;;  %p161_p1 = scmp.ne.s32.totalorder %s557_s20, %s553_s19 }
   0x7   : > { %p162_p2 = scmp.eq.s32.totalorder %s417_s24, 1  ;;  %p167_p3 = scmp.ne.s32.totalorder %s553_s19, %s549_s18 }
   0x8   : > { %s773_s26 = smov (%p32_p0, %s30_s26), 0  ;;  %p168_p5 = scmp.eq.s32.totalorder %s418_s25, 1 }
   0x9   : > { %p642_p4 = por %p162_p2, %p161_p1  ;;  %s146_s29 = ssub.s32 %s565_s22, %s773_s26 }
   0xa   : > { %p421_p6 = scmp.ge.s32.totalorder %s569_s23, 1  ;;  %p149_p7 = scmp.eq.s32.totalorder %s146_s29, 0 }
   0xb   : > { %p649_p8 = por %p168_p5, %p167_p3  ;;  %p208_p9 = scmp.lt.s32.totalorder %s569_s23, 3 }
   0xc   : > { %s655_s6 = scalar_select %p149_p7, %s557_s20, %s151_s27  }
   0xd   : > { %p209_p10 = pnand %p421_p6, %p208_p9 }
   0xe   : > { %p238_p11 = scmp.lt.s32.totalorder (!%p209_p10), %s561_s21, 1  ;;  %s235_s16 = sand.u32 (!%p209_p10), 1, %s553_s19  }
   0xf   : > { %212 = sbr.rel (%p209_p10) target bundleno = 453 (0x1c5), region = 40  ;;  %s422_s17 = sshll.u32 (!%p209_p10), %s235_s16, 2 }
  0x10   : > { %s425_s24 = sshll.u32 (!%p209_p10), %s561_s21, 2  ;;  %s330_s13 = scalar_lea.sflag (!%p209_p10), [#allocation3], %s235_s16 }
  0x11   : > { %s341_s8 = scalar_lea.hbm (!%p209_p10), %s764_s5, %s425_s24 }
  0x12   : > { %s345_s12 = sshll.u32 (!%p209_p10), %s341_s8, 4  ;;  %s346_s12 = int_to_ptr.hbm [resolvable:$true] %s345_s12 }
  0x14   : > { %v261_v0 = vld [vmem:[%s760_s1 + $0x78] sm:$0xff]  ;;  %v260_v1 = vld [vmem:[%s760_s1 + $0x70] sm:$0xff]  ;;  %v259_v2 = vld [vmem:[%s760_s1 + $0x68] sm:$0xff]  ;;  %s239_s14 = scalar_select %p238_p11, %s561_s21, 1  ;;  %vm288_vm0 = vcmask 519168   ;;  %v571_v22 = vmov 64.0  }
  0x15   : > { %262 = vmatpush.msra.mxu0 %v261_v0  ;;  %v258_v3 = vld [vmem:[%s760_s1 + $0x60] sm:$0xff]  ;;  %v257_v4 = vld [vmem:[%s760_s1 + $0x58] sm:$0xff]  ;;  %v256_v5 = vld [vmem:[%s760_s1 + $0x50] sm:$0xff]  ;;  %487 = vrcp.f32 %v571_v22 }
  0x16   : > { %v255_v6 = vld [vmem:[%s760_s1 + $0x48] sm:$0xff]  ;;  %v254_v7 = vld [vmem:[%s760_s1 + $0x40] sm:$0xff]  ;;  %v253_v8 = vld [vmem:[%s760_s1 + $0x38] sm:$0xff]  ;;  %s423_s25 = sshll.u32 %s239_s14, 2  ;;  %s505_s14 = sshra.s32 %s346_s12, 4  ;;  %s506_s14 = int_to_ptr.hbm [resolvable:$true] %s505_s14 }
  0x17   : > { %263 = vmatpush.msra.mxu0 %v260_v1  ;;  %v252_v9 = vld [vmem:[%s760_s1 + $0x30] sm:$0xff]  ;;  %v251_v10 = vld [vmem:[%s760_s1 + $0x28] sm:$0xff]  ;;  %v250_v11 = vld [vmem:[%s760_s1 + $0x20] sm:$0xff]  ;;  %s244_s11 = scalar_lea.vmem %s759_s0, %s423_s25  ;;  %s507_s15 = scalar_lea.hbm %s506_s14, 4 }
  0x18   : > { %v249_v12 = vld [vmem:[%s760_s1 + $0x18] sm:$0xff]  ;;  %v248_v13 = vld [vmem:[%s760_s1 + $0x10] sm:$0xff]  ;;  %v247_v14 = vld [vmem:[%s760_s1 + $0x8] sm:$0xff]  ;;  %p508_p12 = scmp.ne.s32.totalorder %s506_s14, %s507_s15  ;;  %p512_p1 = scmp.lt.s32.totalorder %s506_s14, %s764_s5 }
  0x19   : > { %264 = vmatpush.msra.mxu0 %v259_v2  ;;  %v246_v15 = vld [vmem:[%s760_s1] sm:$0xff] }
  0x1a   : > { %v245_v16 = vld [vmem:[%s244_s11] sm:$0xf]  ;;  %s237_s11 = scalar_lea.vmem [#allocation2], %s422_s17  ;;  %p509_p13 = pnand %p508_p12, %p642_p4 }
  0x1b   : > { %265 = vmatpush.msra.mxu0 %v258_v3  ;;  %v484_v17 = vld [vmem:[%s761_s2] ss:$0 sm:$0xff]  ;;  %v488_v23 = vpop.eup %487  ;;  %s343_s21 = sshll.u32 %s237_s11, 4  ;;  %s511_s17 = scalar_lea.hbm %s764_s5, 8  ;;  %s344_s21 = int_to_ptr.vmem [resolvable:$true] %s343_s21 }
  0x1c   : > { %v293_v24 = vmul.f32 64.0, %v488_v23  ;;  %vm297_vm1 = vweird.f32 %v488_v23  ;;  %v485_v43 = vld [vmem:[%s762_s3] ss:$0 sm:$0xff]  ;;  %p510_p0 = pneg %p509_p13  ;;  %p513_p2 = scmp.lt.s32.totalorder %s511_s17, %s507_s15 }
  0x1d   : > { %266 = vmatpush.msra.mxu0 %v257_v4  ;;  %v486_v46 = vld [vmem:[%s763_s4] ss:$0 sm:$0xff] }
  0x1e   : > { %v294_v25 = vsub.f32 1.0, %v293_v24  ;;  %p514_p3 = por %p513_p2, %p512_p1 }
  0x1f   : > { %267 = vmatpush.msra.mxu0 %v256_v5 }
  0x20   : > { %v295_v26 = vmul.f32 %v488_v23, %v294_v25  ;;  %p515_p5 = pnand %p514_p3, %p510_p0 }
  0x21   : > { %268 = vmatpush.msra.mxu0 %v255_v6 }
  0x22   : > { %v296_v27 = vadd.f32 %v488_v23, %v295_v26 }
  0x23   : > { %269 = vmatpush.msra.mxu0 %v254_v7 }
  0x24   : > { %v298_v28 = vsel %vm297_vm1, %v488_v23, %v296_v27 }
  0x25   : > { %270 = vmatpush.msra.mxu0 %v253_v8 }
  0x27   : > { %271 = vmatpush.msra.mxu0 %v252_v9 }
  0x29   : > { %272 = vmatpush.msra.mxu0 %v251_v10 }
  0x2b   : > { %273 = vmatpush.msra.mxu0 %v250_v11 }
  0x2d   : > { %274 = vmatpush.msra.mxu0 %v249_v12 }
  0x2f   : > { %275 = vmatpush.msra.mxu0 %v248_v13 }
  0x31   : > { %276 = vmatpush.msra.mxu0 %v247_v14 }
  0x33   : > { %277 = vmatpush.msra.mxu0 %v246_v15 }
  0x34   : > { %278 = vmatmul.f32.vlgmr.msra.gmra.mxu0 %v245_v16 }
  0xb1   : > { %v279_v18 = vpop.f32.mrf.mxu0 }
  0xb2   : > { %v282_v19 = vmul.f32 0.25, %v279_v18 }
  0xb4   : > { %v287_v20 = vadd.f32 %v484_v17, %v282_v19 }
  0xb6   : > { %v289_v21 = vsel %vm288_vm0, %v287_v20, 0.0 }
  0xb7   : > { %290 = vadd.xlane.f32.xlu0 %v289_v21 }
 0x12a   : > { %v291_v29 = vpop.xlane.xlu0 %290 }
 0x12b   : > { %v299_v30 = vmul.f32 %v298_v28, %v291_v29 }
 0x12d   : > { %v300_v31 = vsub.f32 %v287_v20, %v299_v30 }
 0x12f   : > { %v301_v32 = vmul.f32 %v300_v31, %v300_v31 }
 0x131   : > { %v302_v33 = vsel %vm288_vm0, %v301_v32, 0.0 }
 0x132   : > { %303 = vadd.xlane.f32.xlu0 %v302_v33 }
 0x1a5   : > { %v304_v34 = vpop.xlane.xlu0 %303 }
 0x1a6   : > { %v305_v35 = vmul.f32 %v304_v34, %v298_v28 }
 0x1a8   : > { %v306_v36 = vadd.f32 1e-05, %v305_v35 }
 0x1aa   : > { %489 = vrsqrt.f32 %v306_v36  ;;  %vm313_vm3 = vweird.f32 %v306_v36 }
 0x1b0   : > { %v490_v37 = vpop.eup %489 }
 0x1b1   : > { %v308_v38 = vmul.f32 %v490_v37, %v306_v36  ;;  %vm314_vm2 = vweird.f32 %v490_v37 }
 0x1b2   : > { %vm315_vm4 = vmor %vm313_vm3, %vm314_vm2 }
 0x1b3   : > { %v309_v39 = vmul.f32 %v490_v37, %v308_v38 }
 0x1b5   : > { %v310_v40 = vmul.f32 0.5, %v309_v39 }
 0x1b7   : > { %v311_v41 = vsub.f32 1.5, %v310_v40 }
 0x1b9   : > { %v312_v42 = vmul.f32 %v490_v37, %v311_v41 }
 0x1bb   : > { %v316_v44 = vsel %vm315_vm4, %v490_v37, %v312_v42 }
 0x1bc   : > { %v317_v45 = vmul.f32 %v316_v44, %v300_v31 }
 0x1be   : > { %v322_v47 = vmul.f32 %v485_v43, %v317_v45 }
 0x1c0   : > { %v327_v48 = vadd.f32 %v486_v46, %v322_v47 }
 0x1c2   : > { %328 = vst.msk [vmem:[%s237_s11] sm:$0xf] %vm288_vm0, %v327_v48 }
 0x1c3   : > { %518 = shalt.err (!%p515_p5)
}
 0x1c4   : > { %428 = dma.vmem_to_hbm [thread:$0]  (%p642_p4), %s344_s21, 64, %s346_s12, %s330_s13  }
 0x1c5 PF: > { %p434_p6 = scmp.ge.s32.totalorder %s569_s23, 2  ;;  %s357_s16 = sand.u32 1, %s549_s18  }
 0x1c6   : > { %s358_s7 = scalar_lea.sflag [#allocation3], %s357_s16 }
 0x1c7   : > { %p431_p7 = pnand %p434_p6, %p649_p8 }
 0x1c9   : > { %p432_p9 = pneg %p431_p7 }
 0x1cb   : > { %544 = dma.done.wait (%p432_p9), %s358_s7, 64  }
 0x1cc   : > { %546 = vsyncadd (%p432_p9), %s358_s7, 4294967232  ;;  %s18_s23 = sadd.s32 1, %s569_s23   ;;  %s767_s18 = smov %s553_s19 }
 0x1cd   : > { %p15_p10 = scmp.ge.s32.totalorder %s18_s23, 4   ;;  %s768_s19 = smov %s557_s20 }
 0x1ce   : > { %s769_s20 = smov %s655_s6  ;;  %s770_s21 = smov %s565_s22 }
 0x1cf   : > { %s771_s22 = smov %s773_s26  ;;  %17 = sbr.rel (!%p15_p10) target bundleno = 4 (0x4), region = 75 }
 0x1d4   :  { %364 = vsyncpa [#allocation3], 1 }
 0x1d5   :  { %366 = vsyncpa [#allocation3 + $0x1], 1 }

</bundles_post_ra>
